<compile_context>
chip_gen: v5e
topology: v5e:2x2
jax: 0.10.0
libtpu: 0.0.40
codegen_flags: <defaults>
</compile_context>

<pallas_src>
import functools

import jax
import jax.numpy as jnp
from jax.experimental import pallas as pl
from jax.experimental.pallas import tpu as pltpu


def _gain_kernel(gb_ref, mod_ref, x_ref, p_ref, w_ref, b_ref, out_ref):
    """Fused adaptive-avg-pool + 1x1 conv + sigmoid gain + modulation.

    gb_ref  : SMEM (1,)            f32   gate "bias" parameter
    mod_ref : VMEM (1, Cin, Hm*Wm)       raw modulation, lane dense (one batch elem)
    x_ref   : VMEM (1, Cout, H*W)        driving input, lane dense
    p_ref   : VMEM (Hm*Wm, H*W)    bf16  0/1 pooling-window indicator (fetched once)
    w_ref   : VMEM (Cout, Cin)     f32   conv weight * slope / (kh*kw)
    b_ref   : VMEM (Cout, 1)       f32   (conv bias - threshold) * slope
    out_ref : VMEM (1, Cout, H*W)        output, lane dense
    """
    # Adaptive average pool as a single lane-dense MXU matmul.  P is a 0/1
    # indicator so "pooled" holds window *sums*; the mean factor lives in w_ref.
    pooled = jnp.dot(mod_ref[0], p_ref[...],
                     preferred_element_type=jnp.float32)           # (Cin, HW) f32

    # 1x1 conv (slope / threshold / 1/(kh*kw) pre-folded) — one tiny matmul.
    pre = jnp.dot(w_ref[...], pooled,
                  preferred_element_type=jnp.float32) + b_ref[...]  # (Cout, HW) f32

    gb = gb_ref[0]
    gate = gb + (1.0 - gb) * jax.nn.sigmoid(pre)                    # EUP, f32 math
    out_ref[0] = (x_ref[0].astype(jnp.float32) * gate).astype(out_ref.dtype)


@functools.partial(jax.jit, static_argnames=("spatial_size",))
def attentional_gain_modulation(x, modulation, conv_w, conv_b,
                                bias_p, slope_p, threshold_p, *, spatial_size):
    """x: (B, Cout, H, W); modulation: (B, Cin, Hm, Wm) — NCHW, f32 or bf16."""
    B, Cout, H, W = x.shape
    Bm, Cin, Hm, Wm = modulation.shape
    assert (H, W) == tuple(spatial_size) and Bm == B
    # TODO(synk): non-divisible AdaptiveAvgPool2d (variable-size windows) is not
    # supported; only the exact block-mean (divisible) case is implemented.
    assert Hm % H == 0 and Wm % W == 0, "non-divisible adaptive pool not supported"
    kh, kw = Hm // H, Wm // W
    HW, HmWm = H * W, Hm * Wm

    # Block-mean pooling as a matmul: P_ind[p, q] = 1 iff flat source pixel p
    # lies inside flat output pixel q's window.  0/1 entries are exact in bf16
    # (halves the only "large" constant stream); mean scale folded into w_f.
    src = ((jnp.arange(Hm)[:, None] // kh) * W
           + (jnp.arange(Wm)[None, :] // kw)).reshape(HmWm)           # (HmWm,)
    p_ind = (src[:, None] == jnp.arange(HW)[None, :]).astype(jnp.bfloat16)  # (HmWm, HW)

    # Fold slope, threshold and the pooling mean factor into the conv params
    # (scalar-only work; never touches the big tensors).
    slope = jnp.asarray(slope_p, jnp.float32).reshape(())
    thr = jnp.asarray(threshold_p, jnp.float32).reshape(())
    w_f = conv_w.reshape(Cout, Cin).astype(jnp.float32) * (slope / (kh * kw))
    b_f = ((conv_b.astype(jnp.float32) - thr) * slope).reshape(Cout, 1)
    gparams = jnp.asarray(bias_p, jnp.float32).reshape(1)             # gate bias

    # Free, contiguous reshapes (channel-major preserved; no transpose pass).
    x_flat = x.reshape(B, Cout, HW)
    mod_flat = modulation.reshape(B, Cin, HmWm)

    out_flat = pl.pallas_call(
        _gain_kernel,
        out_shape=jax.ShapeDtypeStruct((B, Cout, HW), x.dtype),
        grid=(B,),
        in_specs=[
            pl.BlockSpec(memory_space=pltpu.SMEM),                    # gate bias
            pl.BlockSpec((1, Cin, HmWm), lambda b: (b, 0, 0)),        # modulation, lane dense
            pl.BlockSpec((1, Cout, HW), lambda b: (b, 0, 0)),         # x, lane dense
            pl.BlockSpec((HmWm, HW), lambda b: (0, 0)),               # pooling indicator (bf16)
            pl.BlockSpec((Cout, Cin), lambda b: (0, 0)),              # folded conv weight
            pl.BlockSpec((Cout, 1), lambda b: (0, 0)),                # folded conv bias
        ],
        out_specs=pl.BlockSpec((1, Cout, HW), lambda b: (b, 0, 0)),
        compiler_params=pltpu.CompilerParams(
            dimension_semantics=("parallel",),   # >= 2 steps -> both TCs on v7x
        ),
    )(gparams, mod_flat, x_flat, p_ind, w_f, b_f)

    return out_flat.reshape(B, Cout, H, W)


def _reference(x, modulation, conv_w, conv_b, bias_p, slope_p, threshold_p,
               spatial_size):
    B, Cout, H, W = x.shape
    _, Cin, Hm, Wm = modulation.shape
    kh, kw = Hm // H, Wm // W
    mod = modulation.astype(jnp.float32).reshape(B, Cin, H, kh, W, kw).mean(axis=(3, 5))
    conv = jnp.einsum("bchw,oc->bohw", mod,
                      conv_w.reshape(Cout, Cin).astype(jnp.float32)) \
        + conv_b.astype(jnp.float32)[None, :, None, None]
    m = (conv - threshold_p) * slope_p
    gate = bias_p + (1.0 - bias_p) * jax.nn.sigmoid(m)
    return x.astype(jnp.float32) * gate


if __name__ == "__main__":
    key = jax.random.PRNGKey(0)
    k1, k2, k3, k4 = jax.random.split(key, 4)

    B, Cin, Cout = 2, 4, 4
    spatial_size = (16, 16)           # target (H, W) of the adaptive pool
    Hm, Wm = 32, 32                   # modulation input spatial size

    x = jax.random.normal(k1, (B, Cout, *spatial_size), dtype=jnp.float32)
    modulation = jax.random.normal(k2, (B, Cin, Hm, Wm), dtype=jnp.float32)

    # Deterministic parameter init (shapes from the module's __init__).
    conv_w = 0.1 * jax.random.normal(k3, (Cout, Cin, 1, 1), dtype=jnp.float32)
    conv_b = 0.1 * jax.random.normal(k4, (Cout,), dtype=jnp.float32)
    bias_p = jnp.zeros((), jnp.float32)        # nn.Parameter(torch.zeros(1))
    slope_p = jnp.ones((), jnp.float32)        # nn.Parameter(torch.ones(1))
    threshold_p = jnp.zeros((), jnp.float32)   # nn.Parameter(torch.zeros(1))

    ref = _reference(x, modulation, conv_w, conv_b, bias_p, slope_p,
                     threshold_p, spatial_size)

    # f32 storage path.
    out = attentional_gain_modulation(
        x, modulation, conv_w, conv_b, bias_p, slope_p, threshold_p,
        spatial_size=spatial_size)
    out = jax.block_until_ready(out)
    assert out.shape == x.shape
    assert jnp.allclose(out, ref, atol=1e-5, rtol=1e-5), "mismatch vs reference"

    # bf16 storage path (halves HBM bytes on this mem-bound op; math stays f32,
    # bf16 operands feed the MXU natively).
    out_bf16 = attentional_gain_modulation(
        x.astype(jnp.bfloat16), modulation.astype(jnp.bfloat16),
        conv_w, conv_b, bias_p, slope_p, threshold_p,
        spatial_size=spatial_size)
    out_bf16 = jax.block_until_ready(out_bf16)
    assert out_bf16.shape == x.shape and out_bf16.dtype == jnp.bfloat16
    assert jnp.allclose(out_bf16.astype(jnp.float32), ref, atol=1e-1, rtol=1e-1), \
        "bf16 path mismatch vs reference"

    print("KERNEL_OK")
</pallas_src>

<mosaic_0001>
module attributes {stable_mosaic.version = 11 : i64} {
  func.func @_gain_kernel(%arg0: i32, %arg1: memref<1xf32, #tpu.memory_space<smem>>, %arg2: memref<1x4x1024xf32, #tpu.memory_space<vmem>>, %arg3: memref<1x4x256xf32, #tpu.memory_space<vmem>>, %arg4: memref<1024x256xbf16, #tpu.memory_space<vmem>>, %arg5: memref<4x4xf32, #tpu.memory_space<vmem>>, %arg6: memref<4x1xf32, #tpu.memory_space<vmem>>, %arg7: memref<1x4x256xf32, #tpu.memory_space<vmem>>) attributes {dimension_semantics = [#tpu.dimension_semantics<parallel>], iteration_bounds = array<i64: 2>, scalar_prefetch = 0 : i64, scratch_operands = 0 : i64, tpu.core_type = #tpu.core_type<tc>, window_params = [{transform_indices = @transform_0, window_bounds = array<i64: 1>}, {transform_indices = @transform_1, window_bounds = array<i64: 1, 4, 1024>}, {transform_indices = @transform_2, window_bounds = array<i64: 1, 4, 256>}, {pipeline_mode = #tpu.pipeline_mode<synchronous>, transform_indices = @transform_3, window_bounds = array<i64: 1024, 256>}, {pipeline_mode = #tpu.pipeline_mode<synchronous>, transform_indices = @transform_4, window_bounds = array<i64: 4, 4>}, {pipeline_mode = #tpu.pipeline_mode<synchronous>, transform_indices = @transform_5, window_bounds = array<i64: 4, 1>}, {transform_indices = @transform_6, window_bounds = array<i64: 1, 4, 256>}]} {
    %c0 = arith.constant 0 : index
    %c0_0 = arith.constant 0 : index
    %c0_1 = arith.constant 0 : index
    %0 = vector.load %arg2[%c0, %c0_0, %c0_1] : memref<1x4x1024xf32, #tpu.memory_space<vmem>>, vector<1x4x1024xf32>
    %1 = vector.shape_cast %0 : vector<1x4x1024xf32> to vector<4x1024xf32>
    %c0_2 = arith.constant 0 : index
    %c0_3 = arith.constant 0 : index
    %2 = vector.load %arg4[%c0_2, %c0_3] : memref<1024x256xbf16, #tpu.memory_space<vmem>>, vector<1024x256xbf16>
    %cst = arith.constant dense<0.000000e+00> : vector<4x256xf32>
    %3 = tpu.matmul %1, %2, %cst {dimension_numbers = #tpu.dot_dimension_numbers<[1], [0], [0], [1], [0, 0, 1, 1], [], []>} : vector<4x1024xf32>, vector<1024x256xbf16>, vector<4x256xf32> -> vector<4x256xf32>
    %c0_4 = arith.constant 0 : index
    %c0_5 = arith.constant 0 : index
    %4 = vector.load %arg5[%c0_4, %c0_5] : memref<4x4xf32, #tpu.memory_space<vmem>>, vector<4x4xf32>
    %cst_6 = arith.constant dense<0.000000e+00> : vector<4x256xf32>
    %5 = tpu.matmul %4, %3, %cst_6 {dimension_numbers = #tpu.dot_dimension_numbers<[1], [0], [0], [1], [0, 0, 1, 1], [], []>} : vector<4x4xf32>, vector<4x256xf32>, vector<4x256xf32> -> vector<4x256xf32>
    %c0_7 = arith.constant 0 : index
    %c0_8 = arith.constant 0 : index
    %6 = vector.load %arg6[%c0_7, %c0_8] : memref<4x1xf32, #tpu.memory_space<vmem>>, vector<4x1xf32>
    %7 = vector.broadcast %6 : vector<4x1xf32> to vector<4x256xf32>
    %8 = arith.addf %5, %7 : vector<4x256xf32>
    %c0_9 = arith.constant 0 : index
    %9 = memref.load %arg1[%c0_9] : memref<1xf32, #tpu.memory_space<smem>>
    %cst_10 = arith.constant 1.000000e+00 : f32
    %10 = arith.subf %cst_10, %9 : f32
    %11 = arith.negf %8 : vector<4x256xf32>
    %12 = math.exp %11 : vector<4x256xf32>
    %cst_11 = arith.constant 1.000000e+00 : f32
    %13 = vector.broadcast %cst_11 : f32 to vector<4x256xf32>
    %14 = arith.addf %13, %12 : vector<4x256xf32>
    %15 = arith.divf %13, %14 : vector<4x256xf32>
    %16 = vector.broadcast %10 : f32 to vector<4x256xf32>
    %17 = arith.mulf %16, %15 : vector<4x256xf32>
    %18 = vector.broadcast %9 : f32 to vector<4x256xf32>
    %19 = arith.addf %18, %17 : vector<4x256xf32>
    %c0_12 = arith.constant 0 : index
    %c0_13 = arith.constant 0 : index
    %c0_14 = arith.constant 0 : index
    %20 = vector.load %arg3[%c0_12, %c0_13, %c0_14] : memref<1x4x256xf32, #tpu.memory_space<vmem>>, vector<1x4x256xf32>
    %21 = vector.shape_cast %20 : vector<1x4x256xf32> to vector<4x256xf32>
    %22 = arith.mulf %21, %19 : vector<4x256xf32>
    %c0_15 = arith.constant 0 : index
    %c0_16 = arith.constant 0 : index
    %c0_17 = arith.constant 0 : index
    %23 = vector.load %arg7[%c0_15, %c0_16, %c0_17] : memref<1x4x256xf32, #tpu.memory_space<vmem>>, vector<1x4x256xf32>
    %24 = vector.shape_cast %23 : vector<1x4x256xf32> to vector<4x256xf32>
    %25 = vector.shape_cast %22 : vector<4x256xf32> to vector<1x4x256xf32>
    tpu.vector_store %arg7[%c0_15, %c0_16, %c0_17], %25 {strides = array<i32>} : memref<1x4x256xf32, #tpu.memory_space<vmem>>, vector<1x4x256xf32>,
    return
  }
  func.func @transform_0(%arg0: i32) -> i32 {
    %c0_i32 = arith.constant 0 : i32
    %c0_i32_0 = arith.constant 0 : i32
    return %c0_i32 : i32
  }
  func.func @transform_1(%arg0: i32) -> (i32, i32, i32) {
    %c0_i32 = arith.constant 0 : i32
    %c0_i32_0 = arith.constant 0 : i32
    %c0_i32_1 = arith.constant 0 : i32
    return %arg0, %c0_i32, %c0_i32_0 : i32, i32, i32
  }
  func.func @transform_2(%arg0: i32) -> (i32, i32, i32) {
    %c0_i32 = arith.constant 0 : i32
    %c0_i32_0 = arith.constant 0 : i32
    %c0_i32_1 = arith.constant 0 : i32
    return %arg0, %c0_i32, %c0_i32_0 : i32, i32, i32
  }
  func.func @transform_3(%arg0: i32) -> (i32, i32) {
    %c0_i32 = arith.constant 0 : i32
    %c0_i32_0 = arith.constant 0 : i32
    %c0_i32_1 = arith.constant 0 : i32
    return %c0_i32, %c0_i32_0 : i32, i32
  }
  func.func @transform_4(%arg0: i32) -> (i32, i32) {
    %c0_i32 = arith.constant 0 : i32
    %c0_i32_0 = arith.constant 0 : i32
    %c0_i32_1 = arith.constant 0 : i32
    return %c0_i32, %c0_i32_0 : i32, i32
  }
  func.func @transform_5(%arg0: i32) -> (i32, i32) {
    %c0_i32 = arith.constant 0 : i32
    %c0_i32_0 = arith.constant 0 : i32
    %c0_i32_1 = arith.constant 0 : i32
    return %c0_i32, %c0_i32_0 : i32, i32
  }
  func.func @transform_6(%arg0: i32) -> (i32, i32, i32) {
    %c0_i32 = arith.constant 0 : i32
    %c0_i32_0 = arith.constant 0 : i32
    %c0_i32_1 = arith.constant 0 : i32
    return %arg0, %c0_i32, %c0_i32_0 : i32, i32, i32
  }
}

</mosaic_0001>

<bundles_post_ra>
// kernel: attentional_gain_modulation.1
= control target key start
LH: loop header
LB: loop body
LE: loop exit
PB: predicated region body
PF: predicated region fallthrough
CT: control target
= control target key end

     0   :  { %s2170_s23 = smov 0   ;;  %s3019_s0 = inlined_call_operand.<no memory space> [shape: f32[1], index: 0, kind: input, shape index: {}]   ;;  %s3020_s1 = inlined_call_operand.vmem [shape: f32[2,4,1024], index: 1, kind: input, shape index: {}]   ;;  %s3021_s2 = inlined_call_operand.vmem [shape: f32[2,4,256], index: 2, kind: input, shape index: {}]   ;;  %s3022_s3 = inlined_call_operand.vmem [shape: bf16[1024,256], index: 3, kind: input, shape index: {}]   ;;  %s3023_s4 = inlined_call_operand.vmem [shape: f32[4,4], index: 4, kind: input, shape index: {}]   ;;  %s3024_s5 = inlined_call_operand.vmem [shape: f32[4,1], index: 5, kind: input, shape index: {}]   ;;  %s3025_s6 = inlined_call_operand.vmem [shape: f32[2,4,256], index: 6, kind: output, shape index: {}]  }
   0x1   :  { %11 = sst [smem:[#allocation2]] %s3019_s0 }
   0x2 LB: > { %s1443_s24 = sadd.s32 4294967295, %s2129_s23   ;;  %p1447_p0 = scmp.ge.s32.totalorder %s2129_s23, 1  ;;  %s2129_s23 = sphi %s2170_s23, %s17_s23  }
   0x3   : > { %p223_p1 = scmp.lt.s32.totalorder %s2129_s23, 3 }
   0x5   : > { %p224_p2 = pnand %p1447_p0, %p223_p1 }
   0x6   : > { %p258_p3 = scmp.lt.s32.totalorder (!%p224_p2), %s1443_s24, 1  ;;  %s3004_s14 = sld [smem:[#allocation2]] (!%p224_p2) }
   0x7   : > { %227 = sbr.rel (%p224_p2) target bundleno = 446 (0x1be), region = 44 }
   0xc   : > { %v1512_v0 = vld [vmem:[%s3022_s3 + $0x70] sm:$0xf]  ;;  %v1992_v1 = vld [vmem:[%s3022_s3 + $0x74] sm:$0xf0]  ;;  %v1504_v11 = vld [vmem:[%s3022_s3 + $0x60] sm:$0xf] }
   0xd   : > { %v1640_v2 = vld [vmem:[%s3022_s3 + $0x170] sm:$0xf]  ;;  %v1513_v3 = vor.u32 %v1992_v1, %v1512_v0  ;;  %v2024_v4 = vld [vmem:[%s3022_s3 + $0x174] sm:$0xf0]  ;;  %v1990_v13 = vld [vmem:[%s3022_s3 + $0x64] sm:$0xf0] }
   0xe   : > { %v1576_v5 = vld [vmem:[%s3022_s3 + $0xf0] sm:$0xf]  ;;  %v2008_v6 = vld [vmem:[%s3022_s3 + $0xf4] sm:$0xf0]  ;;  %v1641_v7 = vor.u32 %v2024_v4, %v1640_v2  ;;  %v1632_v14 = vld [vmem:[%s3022_s3 + $0x160] sm:$0xf]  ;;  %v1505_v16 = vor.u32 %v1990_v13, %v1504_v11 }
   0xf   : > { %v1577_v8 = vor.u32 %v2008_v6, %v1576_v5  ;;  %v1704_v9 = vld [vmem:[%s3022_s3 + $0x1f0] sm:$0xf]  ;;  %v2040_v10 = vld [vmem:[%s3022_s3 + $0x1f4] sm:$0xf0]  ;;  %1072 = vmatpush.bf16.msra.mxu0 %v1513_v3  ;;  %v2022_v15 = vld [vmem:[%s3022_s3 + $0x164] sm:$0xf0] }
  0x10   : > { %v1705_v12 = vor.u32 %v2040_v10, %v1704_v9  ;;  %1096 = vmatpush.bf16.msra.mxu2 %v1641_v7  ;;  %v1633_v17 = vor.u32 %v2022_v15, %v1632_v14  ;;  %v1568_v18 = vld [vmem:[%s3022_s3 + $0xe0] sm:$0xf]  ;;  %v2006_v19 = vld [vmem:[%s3022_s3 + $0xe4] sm:$0xf0]  ;;  %v1496_v23 = vld [vmem:[%s3022_s3 + $0x50] sm:$0xf] }
  0x11   : > { %1084 = vmatpush.bf16.msra.mxu1 %v1577_v8  ;;  %v1696_v20 = vld [vmem:[%s3022_s3 + $0x1e0] sm:$0xf]  ;;  %v1569_v21 = vor.u32 %v2006_v19, %v1568_v18  ;;  %v2038_v22 = vld [vmem:[%s3022_s3 + $0x1e4] sm:$0xf0]  ;;  %v1988_v24 = vld [vmem:[%s3022_s3 + $0x54] sm:$0xf0] }
  0x12   : > { %1108 = vmatpush.bf16.msra.mxu3 %v1705_v12  ;;  %v1697_v25 = vor.u32 %v2038_v22, %v1696_v20  ;;  %v1624_v26 = vld [vmem:[%s3022_s3 + $0x150] sm:$0xf]  ;;  %v2020_v27 = vld [vmem:[%s3022_s3 + $0x154] sm:$0xf0]  ;;  %v1497_v29 = vor.u32 %v1988_v24, %v1496_v23  ;;  %v1488_v35 = vld [vmem:[%s3022_s3 + $0x40] sm:$0xf] }
  0x13   : > { %v1560_v28 = vld [vmem:[%s3022_s3 + $0xd0] sm:$0xf]  ;;  %1073 = vmatpush.bf16.msra.mxu0 %v1505_v16  ;;  %v2004_v30 = vld [vmem:[%s3022_s3 + $0xd4] sm:$0xf0]  ;;  %v1625_v33 = vor.u32 %v2020_v27, %v1624_v26  ;;  %v1986_v36 = vld [vmem:[%s3022_s3 + $0x44] sm:$0xf0] }
  0x14   : > { %v1688_v31 = vld [vmem:[%s3022_s3 + $0x1d0] sm:$0xf]  ;;  %v2036_v32 = vld [vmem:[%s3022_s3 + $0x1d4] sm:$0xf0]  ;;  %1097 = vmatpush.bf16.msra.mxu2 %v1633_v17  ;;  %v1561_v34 = vor.u32 %v2004_v30, %v1560_v28  ;;  %v1616_v37 = vld [vmem:[%s3022_s3 + $0x140] sm:$0xf]  ;;  %v1489_v44 = vor.u32 %v1986_v36, %v1488_v35 }
  0x15   : > { %1085 = vmatpush.bf16.msra.mxu1 %v1569_v21  ;;  %v1689_v38 = vor.u32 %v2036_v32, %v1688_v31  ;;  %v2018_v39 = vld [vmem:[%s3022_s3 + $0x144] sm:$0xf0]  ;;  %v1552_v40 = vld [vmem:[%s3022_s3 + $0xc0] sm:$0xf]  ;;  %v1480_v47 = vld [vmem:[%s3022_s3 + $0x30] sm:$0xf] }
  0x16   : > { %1109 = vmatpush.bf16.msra.mxu3 %v1697_v25  ;;  %v2002_v41 = vld [vmem:[%s3022_s3 + $0xc4] sm:$0xf0]  ;;  %v1680_v42 = vld [vmem:[%s3022_s3 + $0x1c0] sm:$0xf]  ;;  %v1617_v45 = vor.u32 %v2018_v39, %v1616_v37  ;;  %v1984_v48 = vld [vmem:[%s3022_s3 + $0x34] sm:$0xf0] }
  0x17   : > { %v2034_v43 = vld [vmem:[%s3022_s3 + $0x1c4] sm:$0xf0]  ;;  %1074 = vmatpush.bf16.msra.mxu0 %v1497_v29  ;;  %v1553_v46 = vor.u32 %v2002_v41, %v1552_v40  ;;  %v1608_v49 = vld [vmem:[%s3022_s3 + $0x130] sm:$0xf]  ;;  %v2016_v51 = vld [vmem:[%s3022_s3 + $0x134] sm:$0xf0]  ;;  %v1481_v56 = vor.u32 %v1984_v48, %v1480_v47 }
  0x18   : > { %1098 = vmatpush.bf16.msra.mxu2 %v1625_v33  ;;  %v1681_v50 = vor.u32 %v2034_v43, %v1680_v42  ;;  %v1544_v52 = vld [vmem:[%s3022_s3 + $0xb0] sm:$0xf]  ;;  %v2000_v53 = vld [vmem:[%s3022_s3 + $0xb4] sm:$0xf0]  ;;  %v1609_v57 = vor.u32 %v2016_v51, %v1608_v49  ;;  %v1472_v59 = vld [vmem:[%s3022_s3 + $0x20] sm:$0xf] }
  0x19   : > { %1086 = vmatpush.bf16.msra.mxu1 %v1561_v34  ;;  %v1672_v54 = vld [vmem:[%s3022_s3 + $0x1b0] sm:$0xf]  ;;  %v2032_v55 = vld [vmem:[%s3022_s3 + $0x1b4] sm:$0xf0]  ;;  %v1545_v58 = vor.u32 %v2000_v53, %v1544_v52  ;;  %v1982_v60 = vld [vmem:[%s3022_s3 + $0x24] sm:$0xf0] }
  0x1a   : > { %1110 = vmatpush.bf16.msra.mxu3 %v1689_v38  ;;  %v1600_v61 = vld [vmem:[%s3022_s3 + $0x120] sm:$0xf]  ;;  %v1673_v62 = vor.u32 %v2032_v55, %v1672_v54  ;;  %v2014_v63 = vld [vmem:[%s3022_s3 + $0x124] sm:$0xf0]  ;;  %v1473_v4 = vor.u32 %v1982_v60, %v1472_v59  ;;  %v1464_v7 = vld [vmem:[%s3022_s3 + $0x10] sm:$0xf] }
  0x1b   : > { %1075 = vmatpush.bf16.msra.mxu0 %v1489_v44  ;;  %v1536_v0 = vld [vmem:[%s3022_s3 + $0xa0] sm:$0xf]  ;;  %v1998_v1 = vld [vmem:[%s3022_s3 + $0xa4] sm:$0xf0]  ;;  %v1601_v5 = vor.u32 %v2014_v63, %v1600_v61  ;;  %v1980_v8 = vld [vmem:[%s3022_s3 + $0x14] sm:$0xf0] }
  0x1c   : > { %1099 = vmatpush.bf16.msra.mxu2 %v1617_v45  ;;  %v1664_v2 = vld [vmem:[%s3022_s3 + $0x1a0] sm:$0xf]  ;;  %v2030_v3 = vld [vmem:[%s3022_s3 + $0x1a4] sm:$0xf0]  ;;  %v1537_v6 = vor.u32 %v1998_v1, %v1536_v0  ;;  %v1592_v9 = vld [vmem:[%s3022_s3 + $0x110] sm:$0xf]  ;;  %v1465_v16 = vor.u32 %v1980_v8, %v1464_v7 }
  0x1d   : > { %1087 = vmatpush.bf16.msra.mxu1 %v1553_v46  ;;  %v1665_v10 = vor.u32 %v2030_v3, %v1664_v2  ;;  %v2012_v11 = vld [vmem:[%s3022_s3 + $0x114] sm:$0xf0]  ;;  %v1528_v12 = vld [vmem:[%s3022_s3 + $0x90] sm:$0xf]  ;;  %v1456_v17 = vld [vmem:[%s3022_s3] sm:$0xf] }
  0x1e   : > { %1111 = vmatpush.bf16.msra.mxu3 %v1681_v50  ;;  %v1996_v13 = vld [vmem:[%s3022_s3 + $0x94] sm:$0xf0]  ;;  %v1656_v14 = vld [vmem:[%s3022_s3 + $0x190] sm:$0xf]  ;;  %v1978_v18 = vld [vmem:[%s3022_s3 + $0x4] sm:$0xf0]  ;;  %v1593_v19 = vor.u32 %v2012_v11, %v1592_v9 }
  0x1f   : > { %1076 = vmatpush.bf16.msra.mxu0 %v1481_v56  ;;  %v2028_v15 = vld [vmem:[%s3022_s3 + $0x194] sm:$0xf0]  ;;  %v1529_v20 = vor.u32 %v1996_v13, %v1528_v12  ;;  %v1584_v21 = vld [vmem:[%s3022_s3 + $0x100] sm:$0xf]  ;;  %v2010_v22 = vld [vmem:[%s3022_s3 + $0x104] sm:$0xf0]  ;;  %v1457_v31 = vor.u32 %v1978_v18, %v1456_v17 }
  0x20   : > { %1100 = vmatpush.bf16.msra.mxu2 %v1609_v57  ;;  %v1768_v23 = vld [vmem:[%s3022_s3 + $0x270] sm:$0xf]  ;;  %v1657_v24 = vor.u32 %v2028_v15, %v1656_v14  ;;  %v2056_v25 = vld [vmem:[%s3022_s3 + $0x274] sm:$0xf0]  ;;  %v1520_v28 = vld [vmem:[%s3022_s3 + $0x80] sm:$0xf]  ;;  %v1585_v35 = vor.u32 %v2010_v22, %v1584_v21 }
  0x21   : > { %1088 = vmatpush.bf16.msra.mxu1 %v1545_v58  ;;  %v1896_v26 = vld [vmem:[%s3022_s3 + $0x370] sm:$0xf]  ;;  %v2088_v27 = vld [vmem:[%s3022_s3 + $0x374] sm:$0xf0]  ;;  %v1994_v29 = vld [vmem:[%s3022_s3 + $0x84] sm:$0xf0]  ;;  %v1769_v36 = vor.u32 %v2056_v25, %v1768_v23 }
  0x22   : > { %1112 = vmatpush.bf16.msra.mxu3 %v1673_v62  ;;  %v1648_v30 = vld [vmem:[%s3022_s3 + $0x180] sm:$0xf]  ;;  %v2026_v32 = vld [vmem:[%s3022_s3 + $0x184] sm:$0xf0]  ;;  %v1832_v33 = vld [vmem:[%s3022_s3 + $0x2f0] sm:$0xf]  ;;  %v1897_v39 = vor.u32 %v2088_v27, %v1896_v26  ;;  %v1521_v40 = vor.u32 %v1994_v29, %v1520_v28 }
  0x23   : > { %1077 = vmatpush.bf16.msra.mxu0 %v1473_v4  ;;  %v2072_v34 = vld [vmem:[%s3022_s3 + $0x2f4] sm:$0xf0]  ;;  %v1960_v37 = vld [vmem:[%s3022_s3 + $0x3f0] sm:$0xf]  ;;  %v1760_v41 = vld [vmem:[%s3022_s3 + $0x260] sm:$0xf]  ;;  %v1649_v43 = vor.u32 %v2026_v32, %v1648_v30 }
  0x24   : > { %1101 = vmatpush.bf16.msra.mxu2 %v1601_v5  ;;  %v2104_v38 = vld [vmem:[%s3022_s3 + $0x3f4] sm:$0xf0]  ;;  %v2054_v42 = vld [vmem:[%s3022_s3 + $0x264] sm:$0xf0]  ;;  %v1833_v44 = vor.u32 %v2072_v34, %v1832_v33  ;;  %v1888_v45 = vld [vmem:[%s3022_s3 + $0x360] sm:$0xf] }
  0x25   : > { %1089 = vmatpush.bf16.msra.mxu1 %v1537_v6  ;;  %v2086_v46 = vld [vmem:[%s3022_s3 + $0x364] sm:$0xf0]  ;;  %v1961_v47 = vor.u32 %v2104_v38, %v1960_v37  ;;  %v1824_v48 = vld [vmem:[%s3022_s3 + $0x2e0] sm:$0xf]  ;;  %v1761_v50 = vor.u32 %v2054_v42, %v1760_v41  ;;  %v1752_v54 = vld [vmem:[%s3022_s3 + $0x250] sm:$0xf] }
  0x26   : > { %1113 = vmatpush.bf16.msra.mxu3 %v1665_v10  ;;  %v2070_v49 = vld [vmem:[%s3022_s3 + $0x2e4] sm:$0xf0]  ;;  %v1952_v51 = vld [vmem:[%s3022_s3 + $0x3e0] sm:$0xf]  ;;  %v1889_v53 = vor.u32 %v2086_v46, %v1888_v45  ;;  %v2052_v55 = vld [vmem:[%s3022_s3 + $0x254] sm:$0xf0] }
  0x27   : > { %1078 = vmatpush.bf16.msra.mxu0 %v1465_v16  ;;  %v2102_v52 = vld [vmem:[%s3022_s3 + $0x3e4] sm:$0xf0]  ;;  %v1825_v56 = vor.u32 %v2070_v49, %v1824_v48  ;;  %v1880_v57 = vld [vmem:[%s3022_s3 + $0x350] sm:$0xf]  ;;  %v2084_v58 = vld [vmem:[%s3022_s3 + $0x354] sm:$0xf0]  ;;  %v1753_v62 = vor.u32 %v2052_v55, %v1752_v54 }
  0x28   : > { %1102 = vmatpush.bf16.msra.mxu2 %v1593_v19  ;;  %v1953_v59 = vor.u32 %v2102_v52, %v1952_v51  ;;  %v1816_v60 = vld [vmem:[%s3022_s3 + $0x2d0] sm:$0xf]  ;;  %v2068_v61 = vld [vmem:[%s3022_s3 + $0x2d4] sm:$0xf0]  ;;  %v1881_v1 = vor.u32 %v2084_v58, %v1880_v57  ;;  %v1744_v2 = vld [vmem:[%s3022_s3 + $0x240] sm:$0xf] }
  0x29   : > { %1090 = vmatpush.bf16.msra.mxu1 %v1529_v20  ;;  %v1944_v63 = vld [vmem:[%s3022_s3 + $0x3d0] sm:$0xf]  ;;  %v2100_v0 = vld [vmem:[%s3022_s3 + $0x3d4] sm:$0xf0]  ;;  %v2050_v3 = vld [vmem:[%s3022_s3 + $0x244] sm:$0xf0]  ;;  %v1817_v4 = vor.u32 %v2068_v61, %v1816_v60 }
  0x2a   : > { %1114 = vmatpush.bf16.msra.mxu3 %v1657_v24  ;;  %v1872_v5 = vld [vmem:[%s3022_s3 + $0x340] sm:$0xf]  ;;  %v2082_v6 = vld [vmem:[%s3022_s3 + $0x344] sm:$0xf0]  ;;  %v1945_v7 = vor.u32 %v2100_v0, %v1944_v63  ;;  %v1745_v11 = vor.u32 %v2050_v3, %v1744_v2  ;;  %v1736_v13 = vld [vmem:[%s3022_s3 + $0x230] sm:$0xf] }
  0x2b   : > { %1079 = vmatpush.bf16.msra.mxu0 %v1457_v31  ;;  %v1808_v8 = vld [vmem:[%s3022_s3 + $0x2c0] sm:$0xf]  ;;  %v2066_v9 = vld [vmem:[%s3022_s3 + $0x2c4] sm:$0xf0]  ;;  %v1873_v14 = vor.u32 %v2082_v6, %v1872_v5  ;;  %v2048_v15 = vld [vmem:[%s3022_s3 + $0x234] sm:$0xf0] }
  0x2c   : > { %1103 = vmatpush.bf16.msra.mxu2 %v1585_v35  ;;  %v1936_v10 = vld [vmem:[%s3022_s3 + $0x3c0] sm:$0xf]  ;;  %v2098_v12 = vld [vmem:[%s3022_s3 + $0x3c4] sm:$0xf0]  ;;  %v1864_v16 = vld [vmem:[%s3022_s3 + $0x330] sm:$0xf]  ;;  %v1809_v18 = vor.u32 %v2066_v9, %v1808_v8  ;;  %v1737_v25 = vor.u32 %v2048_v15, %v1736_v13 }
  0x2d   : > { %1091 = vmatpush.bf16.msra.mxu1 %v1521_v40  ;;  %v2080_v17 = vld [vmem:[%s3022_s3 + $0x334] sm:$0xf0]  ;;  %v1800_v19 = vld [vmem:[%s3022_s3 + $0x2b0] sm:$0xf]  ;;  %s3027_s24 = smov (!%p258_p3, %s1443_s24), 1  ;;  %v1937_v21 = vor.u32 %v2098_v12, %v1936_v10  ;;  %vm1275_vm0 = vcmask 1043456  }
  0x2e   : > { %1115 = vmatpush.bf16.msra.mxu3 %v1649_v43  ;;  %v2064_v20 = vld [vmem:[%s3022_s3 + $0x2b4] sm:$0xf0]  ;;  %v1928_v22 = vld [vmem:[%s3022_s3 + $0x3b0] sm:$0xf]  ;;  %v1728_v24 = vld [vmem:[%s3022_s3 + $0x220] sm:$0xf]  ;;  %v1865_v28 = vor.u32 %v2080_v17, %v1864_v16 }
  0x2f   : > { %1120 = vmatpush.bf16.msrb.mxu0 %v1769_v36  ;;  %v2096_v23 = vld [vmem:[%s3022_s3 + $0x3b4] sm:$0xf0]  ;;  %v2046_v26 = vld [vmem:[%s3022_s3 + $0x224] sm:$0xf0]  ;;  %v1856_v27 = vld [vmem:[%s3022_s3 + $0x320] sm:$0xf]  ;;  %v1801_v32 = vor.u32 %v2064_v20, %v1800_v19 }
  0x30   : > { %1144 = vmatpush.bf16.msrb.mxu2 %v1897_v39  ;;  %s1974_s7 = sshll.u32 %s3027_s24, 5  ;;  %v2078_v29 = vld [vmem:[%s3022_s3 + $0x324] sm:$0xf0]  ;;  %v1792_v30 = vld [vmem:[%s3022_s3 + $0x2a0] sm:$0xf]  ;;  %v1929_v37 = vor.u32 %v2096_v23, %v1928_v22  ;;  %v1729_v40 = vor.u32 %v2046_v26, %v1728_v24  ;;  %vm1271_vm1 = vcmask 31744  }
  0x31   : > { %1132 = vmatpush.bf16.msrb.mxu1 %v1833_v44  ;;  %v2062_v31 = vld [vmem:[%s3022_s3 + $0x2a4] sm:$0xf0]  ;;  %s2518_s16 = scalar_lea.vmem %s3020_s1, %s1974_s7  ;;  %v1920_v33 = vld [vmem:[%s3022_s3 + $0x3a0] sm:$0xf]  ;;  %v1720_v38 = vld [vmem:[%s3022_s3 + $0x210] sm:$0xf]  ;;  %v1857_v43 = vor.u32 %v2078_v29, %v1856_v27 }
  0x32   : > { %1156 = vmatpush.bf16.msrb.mxu3 %v1961_v47  ;;  %v2094_v34 = vld [vmem:[%s3022_s3 + $0x3a4] sm:$0xf0]  ;;  %v273_v36 = vld [vmem:[%s2518_s16] sm:$0xff]  ;;  %v2044_v39 = vld [vmem:[%s3022_s3 + $0x214] sm:$0xf0]  ;;  %v1793_v47 = vor.u32 %v2062_v31, %v1792_v30  ;;  %s1323_s15 = ssub.f32 1.0, %s3004_s14 }
  0x33   : > { %1121 = vmatpush.bf16.msrb.mxu0 %v1761_v50  ;;  %v274_v35 = vld [vmem:[%s2518_s16 + $0x8] sm:$0xff]  ;;  %v1848_v41 = vld [vmem:[%s3022_s3 + $0x310] sm:$0xf]  ;;  %v2076_v42 = vld [vmem:[%s3022_s3 + $0x314] sm:$0xf0]  ;;  %v1921_v50 = vor.u32 %v2094_v34, %v1920_v33  ;;  %v1721_v54 = vor.u32 %v2044_v39, %v1720_v38  ;;  %s1975_s17 = sshll.u32 %s3027_s24, 3 }
  0x34   : > { %1145 = vmatpush.bf16.msrb.mxu2 %v1889_v53  ;;  %411 = vst [vmem:[#allocation1 + $0x10] ss:$2 sm:$0xff] %v274_v35  ;;  %v1784_v44 = vld [vmem:[%s3022_s3 + $0x290] sm:$0xf]  ;;  %v2060_v45 = vld [vmem:[%s3022_s3 + $0x294] sm:$0xf0]  ;;  %s267_s20 = scalar_lea.vmem %s3021_s2, %s1975_s17  ;;  %s272_s25 = scalar_lea.vmem %s3025_s6, %s1975_s17 }
  0x35   : > { %1133 = vmatpush.bf16.msrb.mxu1 %v1825_v56  ;;  %409 = vst [vmem:[#allocation1] ss:$2 sm:$0xff] %v273_v36  ;;  %v276_v46 = vld [vmem:[%s2518_s16 + $0x18] sm:$0xff]  ;;  %v1912_v48 = vld [vmem:[%s3022_s3 + $0x390] sm:$0xf]  ;;  %v1785_v0 = vor.u32 %v2060_v45, %v1784_v44 }
  0x36   : > { %1157 = vmatpush.bf16.msrb.mxu3 %v1953_v59  ;;  %v2092_v49 = vld [vmem:[%s3022_s3 + $0x394] sm:$0xf0]  ;;  %415 = vst [vmem:[#allocation1 + $0x30] ss:$2 sm:$0xff] %v276_v46  ;;  %v1712_v51 = vld [vmem:[%s3022_s3 + $0x200] sm:$0xf]  ;;  %v1849_v59 = vor.u32 %v2076_v42, %v1848_v41 }
  0x37   : > { %1122 = vmatpush.bf16.msrb.mxu0 %v1753_v62  ;;  %v2042_v52 = vld [vmem:[%s3022_s3 + $0x204] sm:$0xf0]  ;;  %v275_v53 = vld [vmem:[%s2518_s16 + $0x10] sm:$0xff]  ;;  %v1840_v55 = vld [vmem:[%s3022_s3 + $0x300] sm:$0xf]  ;;  %v1913_v5 = vor.u32 %v2092_v49, %v1912_v48 }
  0x38   : > { %1146 = vmatpush.bf16.msrb.mxu2 %v1881_v1  ;;  %v2074_v56 = vld [vmem:[%s3022_s3 + $0x304] sm:$0xf0]  ;;  %v1991_v57 = vld [vmem:[%s3022_s3 + $0x74] sm:$0xf]  ;;  %v1514_v58 = vld [vmem:[%s3022_s3 + $0x78] sm:$0xf0]  ;;  %v1713_v8 = vor.u32 %v2042_v52, %v1712_v51 }
  0x39   : > { %1134 = vmatpush.bf16.msrb.mxu1 %v1817_v4  ;;  %413 = vst [vmem:[#allocation1 + $0x20] ss:$2 sm:$0xff] %v275_v53  ;;  %v2023_v60 = vld [vmem:[%s3022_s3 + $0x174] sm:$0xf]  ;;  %v1642_v61 = vld [vmem:[%s3022_s3 + $0x178] sm:$0xf0]  ;;  %v1517_v12 = vor.u32 %v1991_v57, %v1514_v58 }
  0x3a   : > { %1158 = vmatpush.bf16.msrb.mxu3 %v1945_v7  ;;  %v1776_v62 = vld [vmem:[%s3022_s3 + $0x280] sm:$0xf]  ;;  %v2058_v63 = vld [vmem:[%s3022_s3 + $0x284] sm:$0xf0]  ;;  %v2007_v7 = vld [vmem:[%s3022_s3 + $0xf4] sm:$0xf]  ;;  %v1645_v15 = vor.u32 %v2023_v60, %v1642_v61 }
  0x3b   : > { %1123 = vmatpush.bf16.msrb.mxu0 %v1745_v11  ;;  %v2584_v1 = vld.sshfl [vmem:[#allocation1 + $0x10] sm:$0xff pattern:$0x75316420]  ;;  %v2586_v2 = vld.sshfl [vmem:[#allocation1 + $0x18] sm:$0xff pattern:$0x75316420]  ;;  %v1841_v11 = vor.u32 %v2074_v56, %v1840_v55  ;;  %v1777_v16 = vor.u32 %v2058_v63, %v1776_v62 }
  0x3c   : > { %1147 = vmatpush.bf16.msrb.mxu2 %v1873_v14  ;;  %v1904_v3 = vld [vmem:[%s3022_s3 + $0x380] sm:$0xf]  ;;  %v2090_v4 = vld [vmem:[%s3022_s3 + $0x384] sm:$0xf0]  ;;  %1116 = vmatmul.f32.vlgmr.msra.gmra.mxu3 %v2586_v2  ;;  %v1578_v10 = vld [vmem:[%s3022_s3 + $0xf8] sm:$0xf0] }
  0x3d   : > { %1135 = vmatpush.bf16.msrb.mxu1 %v1809_v18  ;;  %1104 = vmatmul.f32.vlgmr.msra.gmra.mxu2 %v2584_v1  ;;  %v2595_v6 = vld.sshfl [vmem:[#allocation1] sm:$0xff pattern:$0x75316420]  ;;  %v2601_v9 = vld.sshfl [vmem:[#allocation1 + $0x8] sm:$0xff pattern:$0x75316420]  ;;  %v1905_v20 = vor.u32 %v2090_v4, %v1904_v3 }
  0x3e   : > { %1159 = vmatpush.bf16.msrb.mxu3 %v1937_v21  ;;  %1080 = vmatmul.f32.vlgmr.msra.gmra.mxu0 %v2595_v6  ;;  %v2039_v13 = vld [vmem:[%s3022_s3 + $0x1f4] sm:$0xf]  ;;  %v1706_v14 = vld [vmem:[%s3022_s3 + $0x1f8] sm:$0xf0]  ;;  %v1989_v17 = vld [vmem:[%s3022_s3 + $0x64] sm:$0xf]  ;;  %v1581_v21 = vor.u32 %v2007_v7, %v1578_v10 }
  0x3f   : > { %1124 = vmatpush.bf16.msrb.mxu0 %v1737_v25  ;;  %v1506_v18 = vld [vmem:[%s3022_s3 + $0x68] sm:$0xf0]  ;;  %v2021_v19 = vld [vmem:[%s3022_s3 + $0x164] sm:$0xf]  ;;  %1092 = vmatmul.f32.vlgmr.msra.gmra.mxu1 %v2601_v9  ;;  %v1709_v25 = vor.u32 %v2039_v13, %v1706_v14  ;;  %v1498_v31 = vld [vmem:[%s3022_s3 + $0x58] sm:$0xf0] }
  0x40   : > { %1148 = vmatpush.bf16.msrb.mxu2 %v1865_v28  ;;  %v1634_v22 = vld [vmem:[%s3022_s3 + $0x168] sm:$0xf0]  ;;  %v2005_v23 = vld [vmem:[%s3022_s3 + $0xe4] sm:$0xf]  ;;  %v1987_v28 = vld [vmem:[%s3022_s3 + $0x54] sm:$0xf]  ;;  %v1509_v29 = vor.u32 %v1989_v17, %v1506_v18 }
  0x41   : > { %1136 = vmatpush.bf16.msrb.mxu1 %v1801_v32  ;;  %v1570_v24 = vld [vmem:[%s3022_s3 + $0xe8] sm:$0xf0]  ;;  %v2037_v26 = vld [vmem:[%s3022_s3 + $0x1e4] sm:$0xf]  ;;  %v1637_v32 = vor.u32 %v2021_v19, %v1634_v22  ;;  %v2019_v33 = vld [vmem:[%s3022_s3 + $0x154] sm:$0xf]  ;;  %v1501_v42 = vor.u32 %v1987_v28, %v1498_v31 }
  0x42   : > { %1160 = vmatpush.bf16.msrb.mxu3 %v1929_v37  ;;  %v1698_v27 = vld [vmem:[%s3022_s3 + $0x1e8] sm:$0xf0]  ;;  %v2641_v30 = vld.sshfl [vmem:[#allocation1 + $0x30] sm:$0xff pattern:$0x75316420]  ;;  %v1573_v36 = vor.u32 %v2005_v23, %v1570_v24 }
  0x43   : > { %1125 = vmatpush.bf16.msrb.mxu0 %v1729_v40  ;;  %v1626_v34 = vld [vmem:[%s3022_s3 + $0x158] sm:$0xf0]  ;;  %v2003_v35 = vld [vmem:[%s3022_s3 + $0xd4] sm:$0xf]  ;;  %v1701_v39 = vor.u32 %v2037_v26, %v1698_v27  ;;  %v1985_v46 = vld [vmem:[%s3022_s3 + $0x44] sm:$0xf] }
  0x44   : > { %1149 = vmatpush.bf16.msrb.mxu2 %v1857_v43  ;;  %v2655_v37 = vld.sshfl [vmem:[#allocation1 + $0x20] sm:$0xff pattern:$0x75316420]  ;;  %v1562_v38 = vld [vmem:[%s3022_s3 + $0xd8] sm:$0xf0]  ;;  %v1629_v45 = vor.u32 %v2019_v33, %v1626_v34 }
  0x45   : > { %1137 = vmatpush.bf16.msrb.mxu1 %v1793_v47  ;;  %v2661_v40 = vld.sshfl [vmem:[#allocation1 + $0x38] sm:$0xff pattern:$0x75316420]  ;;  %v2035_v41 = vld [vmem:[%s3022_s3 + $0x1d4] sm:$0xf]  ;;  %v1565_v48 = vor.u32 %v2003_v35, %v1562_v38 }
  0x46   : > { %1161 = vmatpush.bf16.msrb.mxu3 %v1921_v50  ;;  %v2666_v43 = vld.sshfl [vmem:[#allocation1 + $0x28] sm:$0xff pattern:$0x75316420]  ;;  %v1690_v44 = vld [vmem:[%s3022_s3 + $0x1d8] sm:$0xf0] }
  0x47   : > { %1126 = vmatpush.bf16.msrb.mxu0 %v1721_v54  ;;  %v1490_v47 = vld [vmem:[%s3022_s3 + $0x48] sm:$0xf0]  ;;  %v2017_v49 = vld [vmem:[%s3022_s3 + $0x144] sm:$0xf]  ;;  %v1693_v51 = vor.u32 %v2035_v41, %v1690_v44  ;;  %v1983_v58 = vld [vmem:[%s3022_s3 + $0x34] sm:$0xf] }
  0x48   : > { %1150 = vmatpush.bf16.msrb.mxu2 %v1849_v59  ;;  %v1618_v50 = vld [vmem:[%s3022_s3 + $0x148] sm:$0xf0]  ;;  %v2001_v52 = vld [vmem:[%s3022_s3 + $0xc4] sm:$0xf]  ;;  %v1493_v54 = vor.u32 %v1985_v46, %v1490_v47  ;;  %v1482_v59 = vld [vmem:[%s3022_s3 + $0x38] sm:$0xf0] }
  0x49   : > { %1138 = vmatpush.bf16.msrb.mxu1 %v1785_v0  ;;  %v1554_v53 = vld [vmem:[%s3022_s3 + $0xc8] sm:$0xf0]  ;;  %v2033_v55 = vld [vmem:[%s3022_s3 + $0x1c4] sm:$0xf]  ;;  %v1621_v57 = vor.u32 %v2017_v49, %v1618_v50  ;;  %v2015_v61 = vld [vmem:[%s3022_s3 + $0x134] sm:$0xf]  ;;  %v1485_v4 = vor.u32 %v1983_v58, %v1482_v59 }
  0x4a   : > { %1162 = vmatpush.bf16.msrb.mxu3 %v1913_v5  ;;  %v1682_v56 = vld [vmem:[%s3022_s3 + $0x1c8] sm:$0xf0]  ;;  %v1557_v60 = vor.u32 %v2001_v52, %v1554_v53  ;;  %v1610_v62 = vld [vmem:[%s3022_s3 + $0x138] sm:$0xf0]  ;;  %v1999_v0 = vld [vmem:[%s3022_s3 + $0xb4] sm:$0xf] }
  0x4b   : > { %1127 = vmatpush.bf16.msrb.mxu0 %v1713_v8  ;;  %v1685_v63 = vor.u32 %v2033_v55, %v1682_v56  ;;  %v1546_v3 = vld [vmem:[%s3022_s3 + $0xb8] sm:$0xf0]  ;;  %v2031_v5 = vld [vmem:[%s3022_s3 + $0x1b4] sm:$0xf]  ;;  %v1613_v8 = vor.u32 %v2015_v61, %v1610_v62  ;;  %v1981_v10 = vld [vmem:[%s3022_s3 + $0x24] sm:$0xf] }
  0x4c   : > { %1151 = vmatpush.bf16.msrb.mxu2 %v1841_v11  ;;  %v1674_v7 = vld [vmem:[%s3022_s3 + $0x1b8] sm:$0xf0]  ;;  %v1474_v11 = vld [vmem:[%s3022_s3 + $0x28] sm:$0xf0]  ;;  %v2013_v13 = vld [vmem:[%s3022_s3 + $0x124] sm:$0xf] }
  0x4d   : > { %1139 = vmatpush.bf16.msrb.mxu1 %v1777_v16  ;;  %v1602_v14 = vld [vmem:[%s3022_s3 + $0x128] sm:$0xf0]  ;;  %v1997_v16 = vld [vmem:[%s3022_s3 + $0xa4] sm:$0xf]  ;;  %v1477_v18 = vor.u32 %v1981_v10, %v1474_v11  ;;  %v1979_v22 = vld [vmem:[%s3022_s3 + $0x14] sm:$0xf] }
  0x4e   : > { %1163 = vmatpush.bf16.msrb.mxu3 %v1905_v20  ;;  %1128 = vmatmul.f32.vlgmr.msrb.gmra.mxu0 %v2655_v37  ;;  %v1538_v17 = vld [vmem:[%s3022_s3 + $0xa8] sm:$0xf0]  ;;  %v2029_v19 = vld [vmem:[%s3022_s3 + $0x1a4] sm:$0xf]  ;;  %v1466_v23 = vld [vmem:[%s3022_s3 + $0x18] sm:$0xf0] }
  0x4f   : > { %1168 = vmatpush.bf16.msra.mxu0 %v1517_v12  ;;  %1152 = vmatmul.f32.vlgmr.msrb.gmra.mxu2 %v2641_v30  ;;  %v1549_v12 = vor.u32 %v1999_v0, %v1546_v3  ;;  %v1666_v20 = vld [vmem:[%s3022_s3 + $0x1a8] sm:$0xf0]  ;;  %v1541_v24 = vor.u32 %v1997_v16, %v1538_v17  ;;  %v1594_v26 = vld [vmem:[%s3022_s3 + $0x118] sm:$0xf0]  ;;  %v1995_v28 = vld [vmem:[%s3022_s3 + $0x94] sm:$0xf] }
  0x50   : > { %1192 = vmatpush.bf16.msra.mxu2 %v1645_v15  ;;  %1140 = vmatmul.f32.vlgmr.msrb.gmra.mxu1 %v2666_v43  ;;  %v1677_v15 = vor.u32 %v2031_v5, %v1674_v7  ;;  %v1669_v27 = vor.u32 %v2029_v19, %v1666_v20  ;;  %v2027_v31 = vld [vmem:[%s3022_s3 + $0x194] sm:$0xf]  ;;  %v1658_v33 = vld [vmem:[%s3022_s3 + $0x198] sm:$0xf0]  ;;  %v1977_v34 = vld [vmem:[%s3022_s3 + $0x4] sm:$0xf] }
  0x51   : > { %1180 = vmatpush.bf16.msra.mxu1 %v1581_v21  ;;  %1164 = vmatmul.f32.vlgmr.msrb.gmra.mxu3 %v2661_v40  ;;  %v1605_v21 = vor.u32 %v2013_v13, %v1602_v14  ;;  %v1458_v35 = vld [vmem:[%s3022_s3 + $0x8] sm:$0xf0]  ;;  %v2009_v38 = vld [vmem:[%s3022_s3 + $0x104] sm:$0xf]  ;;  %v2055_v41 = vld [vmem:[%s3022_s3 + $0x274] sm:$0xf]  ;;  %v1661_v47 = vor.u32 %v2027_v31, %v1658_v33 }
  0x52   : > { %1204 = vmatpush.bf16.msra.mxu3 %v1709_v25  ;;  %v2011_v25 = vld [vmem:[%s3022_s3 + $0x114] sm:$0xf]  ;;  %v1770_v44 = vld [vmem:[%s3022_s3 + $0x278] sm:$0xf0]  ;;  %v1522_v49 = vld [vmem:[%s3022_s3 + $0x88] sm:$0xf0] }
  0x53   : > { %1169 = vmatpush.bf16.msra.mxu0 %v1509_v29  ;;  %v1530_v29 = vld [vmem:[%s3022_s3 + $0x98] sm:$0xf0]  ;;  %v2025_v50 = vld [vmem:[%s3022_s3 + $0x184] sm:$0xf]  ;;  %v1650_v52 = vld [vmem:[%s3022_s3 + $0x188] sm:$0xf0]  ;;  %v1773_v56 = vor.u32 %v2055_v41, %v1770_v44 }
  0x54   : > { %1193 = vmatpush.bf16.msra.mxu2 %v1637_v32  ;;  %v1469_v32 = vor.u32 %v1979_v22, %v1466_v23  ;;  %v1898_v46 = vld [vmem:[%s3022_s3 + $0x378] sm:$0xf0]  ;;  %v2071_v53 = vld [vmem:[%s3022_s3 + $0x2f4] sm:$0xf]  ;;  %v2053_v61 = vld [vmem:[%s3022_s3 + $0x264] sm:$0xf] }
  0x55   : > { %1181 = vmatpush.bf16.msra.mxu1 %v1573_v36  ;;  %v1597_v36 = vor.u32 %v2011_v25, %v1594_v26  ;;  %v1962_v58 = vld [vmem:[%s3022_s3 + $0x3f8] sm:$0xf0]  ;;  %v1762_v62 = vld [vmem:[%s3022_s3 + $0x268] sm:$0xf0]  ;;  %v2085_v3 = vld [vmem:[%s3022_s3 + $0x364] sm:$0xf] }
  0x56   : > { %1205 = vmatpush.bf16.msra.mxu3 %v1701_v39  ;;  %v1586_v39 = vld [vmem:[%s3022_s3 + $0x108] sm:$0xf0]  ;;  %v2069_v7 = vld [vmem:[%s3022_s3 + $0x2e4] sm:$0xf]  ;;  %v1765_v10 = vor.u32 %v2053_v61, %v1762_v62  ;;  %v2051_v14 = vld [vmem:[%s3022_s3 + $0x254] sm:$0xf] }
  0x57   : > { %1170 = vmatpush.bf16.msra.mxu0 %v1501_v42  ;;  %v1533_v42 = vor.u32 %v1995_v28, %v1530_v29  ;;  %v1589_v55 = vor.u32 %v2009_v38, %v1586_v39  ;;  %v2101_v11 = vld [vmem:[%s3022_s3 + $0x3e4] sm:$0xf]  ;;  %v2083_v17 = vld [vmem:[%s3022_s3 + $0x354] sm:$0xf]  ;;  %v1866_v41 = vld [vmem:[%s3022_s3 + $0x338] sm:$0xf0] }
  0x58   : > { %1194 = vmatpush.bf16.msra.mxu2 %v1629_v45  ;;  %v2087_v45 = vld [vmem:[%s3022_s3 + $0x374] sm:$0xf]  ;;  %v2049_v26 = vld [vmem:[%s3022_s3 + $0x244] sm:$0xf] }
  0x59   : > { %1182 = vmatpush.bf16.msra.mxu1 %v1565_v48  ;;  %v1993_v48 = vld [vmem:[%s3022_s3 + $0x84] sm:$0xf]  ;;  %v1901_v59 = vor.u32 %v2087_v45, %v1898_v46  ;;  %v2067_v20 = vld [vmem:[%s3022_s3 + $0x2d4] sm:$0xf]  ;;  %v1802_v45 = vld [vmem:[%s3022_s3 + $0x2b8] sm:$0xf0] }
  0x5a   : > { %1206 = vmatpush.bf16.msra.mxu3 %v1693_v51  ;;  %v1461_v51 = vor.u32 %v1977_v34, %v1458_v35  ;;  %v2099_v23 = vld [vmem:[%s3022_s3 + $0x3d4] sm:$0xf]  ;;  %v2081_v28 = vld [vmem:[%s3022_s3 + $0x344] sm:$0xf] }
  0x5b   : > { %1171 = vmatpush.bf16.msra.mxu0 %v1493_v54  ;;  %v1834_v54 = vld [vmem:[%s3022_s3 + $0x2f8] sm:$0xf0]  ;;  %v2065_v31 = vld [vmem:[%s3022_s3 + $0x2c4] sm:$0xf]  ;;  %v2047_v35 = vld [vmem:[%s3022_s3 + $0x234] sm:$0xf] }
  0x5c   : > { %1195 = vmatpush.bf16.msra.mxu2 %v1621_v57  ;;  %v2103_v57 = vld [vmem:[%s3022_s3 + $0x3f4] sm:$0xf]  ;;  %v1837_v0 = vor.u32 %v2071_v53, %v1834_v54  ;;  %v2097_v33 = vld [vmem:[%s3022_s3 + $0x3c4] sm:$0xf]  ;;  %v1858_v54 = vld [vmem:[%s3022_s3 + $0x328] sm:$0xf0] }
  0x5d   : > { %1183 = vmatpush.bf16.msra.mxu1 %v1557_v60  ;;  %v1525_v60 = vor.u32 %v1993_v48, %v1522_v49  ;;  %v1965_v5 = vor.u32 %v2103_v57, %v1962_v58  ;;  %v2079_v39 = vld [vmem:[%s3022_s3 + $0x334] sm:$0xf]  ;;  %v1930_v48 = vld [vmem:[%s3022_s3 + $0x3b8] sm:$0xf0]  ;;  %v2077_v53 = vld [vmem:[%s3022_s3 + $0x324] sm:$0xf] }
  0x5e   : > { %1207 = vmatpush.bf16.msra.mxu3 %v1685_v63  ;;  %v1653_v63 = vor.u32 %v2025_v50, %v1650_v52  ;;  %v2063_v44 = vld [vmem:[%s3022_s3 + $0x2b4] sm:$0xf]  ;;  %v1869_v49 = vor.u32 %v2079_v39, %v1866_v41  ;;  %v2045_v50 = vld [vmem:[%s3022_s3 + $0x224] sm:$0xf]  ;;  %v1794_v57 = vld [vmem:[%s3022_s3 + $0x2a8] sm:$0xf0]  ;;  %v1861_v61 = vor.u32 %v2077_v53, %v1858_v54 }
  0x5f   : > { %1172 = vmatpush.bf16.msra.mxu0 %v1485_v4  ;;  %v1890_v4 = vld [vmem:[%s3022_s3 + $0x368] sm:$0xf0]  ;;  %v1805_v52 = vor.u32 %v2063_v44, %v1802_v45  ;;  %v2043_v62 = vld [vmem:[%s3022_s3 + $0x214] sm:$0xf]  ;;  %v1265_v39 = vld [vmem:[%s3024_s5] sm:$0xf] }
  0x60   : > { %1196 = vmatpush.bf16.msra.mxu2 %v1613_v8  ;;  %v1826_v8 = vld [vmem:[%s3022_s3 + $0x2e8] sm:$0xf0]  ;;  %v1893_v13 = vor.u32 %v2085_v3, %v1890_v4  ;;  %v2075_v3 = vld [vmem:[%s3022_s3 + $0x314] sm:$0xf]  ;;  %v1850_v4 = vld [vmem:[%s3022_s3 + $0x318] sm:$0xf0] }
  0x61   : > { %1184 = vmatpush.bf16.msra.mxu1 %v1549_v12  ;;  %v1954_v12 = vld [vmem:[%s3022_s3 + $0x3e8] sm:$0xf0]  ;;  %v1829_v16 = vor.u32 %v2069_v7, %v1826_v8  ;;  %v2059_v7 = vld [vmem:[%s3022_s3 + $0x294] sm:$0xf]  ;;  %v1786_v8 = vld [vmem:[%s3022_s3 + $0x298] sm:$0xf0] }
  0x62   : > { %1208 = vmatpush.bf16.msra.mxu3 %v1677_v15  ;;  %v1754_v15 = vld [vmem:[%s3022_s3 + $0x258] sm:$0xf0]  ;;  %v1957_v19 = vor.u32 %v2101_v11, %v1954_v12  ;;  %v2091_v11 = vld [vmem:[%s3022_s3 + $0x394] sm:$0xf] }
  0x63   : > { %1173 = vmatpush.bf16.msra.mxu0 %v1477_v18  ;;  %v1882_v18 = vld [vmem:[%s3022_s3 + $0x358] sm:$0xf0]  ;;  %v1757_v22 = vor.u32 %v2051_v14, %v1754_v15  ;;  %v2041_v14 = vld [vmem:[%s3022_s3 + $0x204] sm:$0xf]  ;;  %v1714_v15 = vld [vmem:[%s3022_s3 + $0x208] sm:$0xf0] }
  0x64   : > { %1197 = vmatpush.bf16.msra.mxu2 %v1605_v21  ;;  %v1818_v21 = vld [vmem:[%s3022_s3 + $0x2d8] sm:$0xf0]  ;;  %v1885_v25 = vor.u32 %v2083_v17, %v1882_v18  ;;  %v2073_v17 = vld [vmem:[%s3022_s3 + $0x304] sm:$0xf]  ;;  %v1842_v18 = vld [vmem:[%s3022_s3 + $0x308] sm:$0xf0] }
  0x65   : > { %1185 = vmatpush.bf16.msra.mxu1 %v1541_v24  ;;  %v1946_v24 = vld [vmem:[%s3022_s3 + $0x3d8] sm:$0xf0] }
  0x66   : > { %1209 = vmatpush.bf16.msra.mxu3 %v1669_v27  ;;  %v1821_v27 = vor.u32 %v2067_v20, %v1818_v21  ;;  %v1949_v29 = vor.u32 %v2099_v23, %v1946_v24  ;;  %v1914_v12 = vld [vmem:[%s3022_s3 + $0x398] sm:$0xf0]  ;;  %v2057_v20 = vld [vmem:[%s3022_s3 + $0x284] sm:$0xf]  ;;  %v1778_v21 = vld [vmem:[%s3022_s3 + $0x288] sm:$0xf0] }
  0x67   : > { %1174 = vmatpush.bf16.msra.mxu0 %v1469_v32  ;;  %v2089_v23 = vld [vmem:[%s3022_s3 + $0x384] sm:$0xf]  ;;  %v1906_v24 = vld [vmem:[%s3022_s3 + $0x388] sm:$0xf0] }
  0x68   : > { %1198 = vmatpush.bf16.msra.mxu2 %v1597_v36  ;;  %v1738_v36 = vld [vmem:[%s3022_s3 + $0x238] sm:$0xf0] }
  0x69   : > { %1186 = vmatpush.bf16.msra.mxu1 %v1533_v42  ;;  %v1741_v46 = vor.u32 %v2047_v35, %v1738_v36 }
  0x6a   : > { %1210 = vmatpush.bf16.msra.mxu3 %v1661_v47  ;;  %v2095_v47 = vld [vmem:[%s3022_s3 + $0x3b4] sm:$0xf] }
  0x6b   : > { %1175 = vmatpush.bf16.msra.mxu0 %v1461_v51  ;;  %v1730_v51 = vld [vmem:[%s3022_s3 + $0x228] sm:$0xf0] }
  0x6c   : > { %1199 = vmatpush.bf16.msra.mxu2 %v1589_v55  ;;  %v1933_v55 = vor.u32 %v2095_v47, %v1930_v48  ;;  %v1733_v58 = vor.u32 %v2045_v50, %v1730_v51 }
  0x6d   : > { %1187 = vmatpush.bf16.msra.mxu1 %v1525_v60  ;;  %v1922_v60 = vld [vmem:[%s3022_s3 + $0x3a8] sm:$0xf0] }
  0x6e   : > { %1211 = vmatpush.bf16.msra.mxu3 %v1653_v63  ;;  %1176 = vmatmul.f32.vlgmr.msra.gmra.mxu0 %v2595_v6  ;;  %v1810_v6 = vld [vmem:[%s3022_s3 + $0x2c8] sm:$0xf0]  ;;  %v1722_v63 = vld [vmem:[%s3022_s3 + $0x218] sm:$0xf0] }
  0x6f   : > { %1216 = vmatpush.bf16.msrb.mxu0 %v1773_v56  ;;  %1200 = vmatmul.f32.vlgmr.msra.gmra.mxu2 %v2584_v1  ;;  %v1746_v1 = vld [vmem:[%s3022_s3 + $0x248] sm:$0xf0]  ;;  %v1813_v38 = vor.u32 %v2065_v31, %v1810_v6  ;;  %v2061_v56 = vld [vmem:[%s3022_s3 + $0x2a4] sm:$0xf] }
  0x70   : > { %1240 = vmatpush.bf16.msrb.mxu2 %v1901_v59  ;;  %1188 = vmatmul.f32.vlgmr.msra.gmra.mxu1 %v2601_v9  ;;  %v1874_v9 = vld [vmem:[%s3022_s3 + $0x348] sm:$0xf0]  ;;  %v1749_v32 = vor.u32 %v2049_v26, %v1746_v1  ;;  %v2093_v59 = vld [vmem:[%s3022_s3 + $0x3a4] sm:$0xf]  ;;  %v1781_v26 = vor.u32 %v2057_v20, %v1778_v21  ;;  %v1909_v1 = vor.u32 %v2089_v23, %v1906_v24 }
  0x71   : > { %1228 = vmatpush.bf16.msrb.mxu1 %v1837_v0  ;;  %1212 = vmatmul.f32.vlgmr.msra.gmra.mxu3 %v2586_v2  ;;  %v1938_v2 = vld [vmem:[%s3022_s3 + $0x3c8] sm:$0xf0]  ;;  %v1877_v34 = vor.u32 %v2081_v28, %v1874_v9  ;;  %v1797_v0 = vor.u32 %v2061_v56, %v1794_v57 }
  0x72   : > { %1252 = vmatpush.bf16.msrb.mxu3 %v1965_v5  ;;  %v1941_v42 = vor.u32 %v2097_v33, %v1938_v2  ;;  %v1925_v5 = vor.u32 %v2093_v59, %v1922_v60 }
  0x73   : > { %1217 = vmatpush.bf16.msrb.mxu0 %v1765_v10  ;;  %v1725_v10 = vor.u32 %v2043_v62, %v1722_v63 }
  0x74   : > { %1241 = vmatpush.bf16.msrb.mxu2 %v1893_v13  ;;  %v1853_v13 = vor.u32 %v2075_v3, %v1850_v4 }
  0x75   : > { %1229 = vmatpush.bf16.msrb.mxu1 %v1829_v16  ;;  %v1789_v16 = vor.u32 %v2059_v7, %v1786_v8 }
  0x76   : > { %1253 = vmatpush.bf16.msrb.mxu3 %v1957_v19  ;;  %v1917_v19 = vor.u32 %v2091_v11, %v1914_v12 }
  0x77   : > { %1218 = vmatpush.bf16.msrb.mxu0 %v1757_v22  ;;  %v1717_v22 = vor.u32 %v2041_v14, %v1714_v15 }
  0x78   : > { %1242 = vmatpush.bf16.msrb.mxu2 %v1885_v25  ;;  %v1845_v25 = vor.u32 %v2073_v17, %v1842_v18 }
  0x79   : > { %1230 = vmatpush.bf16.msrb.mxu1 %v1821_v27 }
  0x7a   : > { %1254 = vmatpush.bf16.msrb.mxu3 %v1949_v29 }
  0x7b   : > { %1219 = vmatpush.bf16.msrb.mxu0 %v1749_v32 }
  0x7c   : > { %1243 = vmatpush.bf16.msrb.mxu2 %v1877_v34 }
  0x7d   : > { %1231 = vmatpush.bf16.msrb.mxu1 %v1813_v38 }
  0x7e   : > { %1255 = vmatpush.bf16.msrb.mxu3 %v1941_v42 }
  0x7f   : > { %1220 = vmatpush.bf16.msrb.mxu0 %v1741_v46 }
  0x80   : > { %1244 = vmatpush.bf16.msrb.mxu2 %v1869_v49 }
  0x81   : > { %1232 = vmatpush.bf16.msrb.mxu1 %v1805_v52 }
  0x82   : > { %1256 = vmatpush.bf16.msrb.mxu3 %v1933_v55 }
  0x83   : > { %1221 = vmatpush.bf16.msrb.mxu0 %v1733_v58 }
  0x84   : > { %1245 = vmatpush.bf16.msrb.mxu2 %v1861_v61 }
  0x85   : > { %1233 = vmatpush.bf16.msrb.mxu1 %v1797_v0 }
  0x86   : > { %1257 = vmatpush.bf16.msrb.mxu3 %v1925_v5 }
  0x87   : > { %1222 = vmatpush.bf16.msrb.mxu0 %v1725_v10 }
  0x88   : > { %1246 = vmatpush.bf16.msrb.mxu2 %v1853_v13 }
  0x89   : > { %1234 = vmatpush.bf16.msrb.mxu1 %v1789_v16 }
  0x8a   : > { %1258 = vmatpush.bf16.msrb.mxu3 %v1917_v19 }
  0x8b   : > { %1223 = vmatpush.bf16.msrb.mxu0 %v1717_v22 }
  0x8c   : > { %1247 = vmatpush.bf16.msrb.mxu2 %v1845_v25  ;;  %v1362_v25 = vstv %s1323_s15 }
  0x8d   : > { %1235 = vmatpush.bf16.msrb.mxu1 %v1781_v26 }
  0x8e   : > { %1259 = vmatpush.bf16.msrb.mxu3 %v1909_v1  ;;  %1224 = vmatmul.f32.vlgmr.msrb.gmra.mxu0 %v2655_v37 }
  0x8f   : > { %1248 = vmatmul.f32.vlgmr.msrb.gmra.mxu2 %v2641_v30 }
  0x90   : > { %1236 = vmatmul.f32.vlgmr.msrb.gmra.mxu1 %v2666_v43  ;;  %v2131_v43 = vmov 0  }
  0x91   : > { %1260 = vmatmul.f32.vlgmr.msrb.gmra.mxu3 %v2661_v40  ;;  %v1264_v40 = vld [vmem:[%s3023_s4] sm:$0xf]  ;;  %2114 = vset.pattern.permute.xlu0 %v2131_v43 }
  0x92   : > { %1268 = vperm.xlu0 %2114, %v1265_v39  }
  0xbb   : > { %v1081_v27 = vpop.f32.mrf.mxu0 }
  0xbc   : > { %v1093_v28 = vpop.f32.mrf.mxu1 }
  0xbd   : > { %v1094_v9 = vadd.f32 %v1093_v28, %v1081_v27 }
  0xbf   : > { %v1117_v6 = vpop.f32.mrf.mxu3 }
  0xc0   : > { %v1105_v29 = vpop.f32.mrf.mxu2 }
  0xc1   : > { %v1106_v31 = vadd.f32 %v1105_v29, %v1094_v9  ;;  %v1365_v29 = vstv %s3004_s14 }
  0xc3   : > { %v1118_v32 = vadd.f32 %v1117_v6, %v1106_v31 }
  0xcb   : > { %v1129_v33 = vpop.f32.mrf.mxu0 }
  0xcc   : > { %v1130_v2 = vadd.f32 %v1129_v33, %v1118_v32  ;;  %v1368_v32 = vld [vmem:[%s267_s20] sm:$0xff] }
  0xcd   : > { %v1141_v34 = vpop.f32.mrf.mxu1 }
  0xce   : > { %v1142_v35 = vadd.f32 %v1141_v34, %v1130_v2 }
  0xd2   : > { %v1153_v36 = vpop.f32.mrf.mxu2 }
  0xd3   : > { %v1154_v38 = vadd.f32 %v1153_v36, %v1142_v35 }
  0xd4   : > { %v1165_v37 = vpop.f32.mrf.mxu3 }
  0xd5   : > { %v1166_v30 = vadd.f32 %v1165_v37, %v1154_v38 }
  0xd7   : > { %1966 = vmatpush.msk.msra.mxu0 %vm1275_vm0, %v1166_v30 }
  0xd8   : > { %1967 = vmatmul.msk.f32.vlgmr.msra.gmra.mxu0 %vm1271_vm1, %v1264_v40 }
  0xeb   : > { %v1177_v42 = vpop.f32.mrf.mxu0 }
  0xed   : > { %v1189_v41 = vpop.f32.mrf.mxu1 }
  0xee   : > { %v1190_v44 = vadd.f32 %v1189_v41, %v1177_v42 }
  0xf2   : > { %v1201_v45 = vpop.f32.mrf.mxu2 }
  0xf3   : > { %v1202_v46 = vadd.f32 %v1201_v45, %v1190_v44 }
  0xf4   : > { %v1213_v47 = vpop.f32.mrf.mxu3 }
  0xf5   : > { %v1214_v48 = vadd.f32 %v1213_v47, %v1202_v46 }
 0x104   : > { %v1269_v57 = vpop.permute.xlu0 %1268 }
 0x10b   : > { %v1225_v49 = vpop.f32.mrf.mxu0 }
 0x10c   : > { %v1226_v50 = vadd.f32 %v1225_v49, %v1214_v48 }
 0x10d   : > { %v1237_v51 = vpop.f32.mrf.mxu1 }
 0x10e   : > { %v1238_v52 = vadd.f32 %v1237_v51, %v1226_v50 }
 0x112   : > { %v1249_v53 = vpop.f32.mrf.mxu2 }
 0x113   : > { %v1250_v54 = vadd.f32 %v1249_v53, %v1238_v52 }
 0x114   : > { %v1261_v55 = vpop.f32.mrf.mxu3 }
 0x115   : > { %v1262_v56 = vadd.f32 %v1261_v55, %v1250_v54 }
 0x117   : > { %1968 = vmatpush.msk.msra.mxu1 %vm1275_vm0, %v1262_v56 }
 0x118   : > { %1969 = vmatmul.msk.f32.vlgmr.msra.gmra.mxu1 %vm1271_vm1, %v1264_v40 }
 0x155   : > { %v1299_v58 = vpop.f32.mrf.mxu0 }
 0x156   : > { %v1300_v59 = vadd.f32 %v1299_v58, %v1269_v57 }
 0x158   : > { %v1970_v60 = vmul.f32 -1.442695, %v1300_v59 }
 0x15a   : > { %2115 = vpow2.f32 %v1970_v60 }
 0x160   : > { %v2116_v61 = vpop.eup %2115 }
 0x161   : > { %v1330_v62 = vadd.f32 1.0, %v2116_v61 }
 0x163   : > { %2117 = vrcp.f32 %v1330_v62  ;;  %vm1337_vm2 = vweird.f32 %v1330_v62  ;;  %v1341_v13 = vand.u32 2147483647, %v1330_v62  ;;  %v1343_v14 = vand.u32 2147483648, %v1330_v62 }
 0x165   : > { %vm1342_vm5 = vcmp.eq.f32.partialorder %v1341_v13, 8.507059e+37  ;;  %v1344_v18 = vor.u32 1.1754944e-38, %v1343_v14 }
 0x169   : > { %v2118_v4 = vpop.eup %2117 }
 0x16a   : > { %v1333_v5 = vmul.f32 %v2118_v4, %v1330_v62  ;;  %vm1338_vm3 = vweird.f32 %v2118_v4 }
 0x16b   : > { %vm1339_vm4 = vmor %vm1337_vm2, %vm1338_vm3 }
 0x16c   : > { %v1334_v10 = vsub.f32 1.0, %v1333_v5 }
 0x16e   : > { %v1335_v11 = vmul.f32 %v2118_v4, %v1334_v10 }
 0x170   : > { %v1336_v15 = vadd.f32 %v2118_v4, %v1335_v11 }
 0x172   : > { %v1340_v20 = vsel %vm1339_vm4, %v2118_v4, %v1336_v15 }
 0x173   : > { %v1345_v24 = vsel %vm1342_vm5, %v1344_v18, %v1340_v20 }
 0x174   : > { %v1363_v28 = vmul.f32 %v1362_v25, %v1345_v24 }
 0x176   : > { %v1366_v6 = vadd.f32 %v1365_v29, %v1363_v28 }
 0x195   : > { %v1319_v63 = vpop.f32.mrf.mxu1 }
 0x196   : > { %v1320_v0 = vadd.f32 %v1319_v63, %v1269_v57 }
 0x198   : > { %v1971_v3 = vmul.f32 -1.442695, %v1320_v0 }
 0x19a   : > { %2119 = vpow2.f32 %v1971_v3 }
 0x1a0   : > { %v2120_v7 = vpop.eup %2119 }
 0x1a1   : > { %v1331_v8 = vadd.f32 1.0, %v2120_v7 }
 0x1a3   : > { %2121 = vrcp.f32 %v1331_v8  ;;  %v1358_v19 = vand.u32 2147483648, %v1331_v8  ;;  %v1356_v22 = vand.u32 2147483647, %v1331_v8  ;;  %vm1352_vm7 = vweird.f32 %v1331_v8 }
 0x1a5   : > { %v1359_v26 = vor.u32 1.1754944e-38, %v1358_v19  ;;  %vm1357_vm9 = vcmp.eq.f32.partialorder %v1356_v22, 8.507059e+37 }
 0x1a9   : > { %v2122_v12 = vpop.eup %2121 }
 0x1aa   : > { %v1348_v16 = vmul.f32 %v2122_v12, %v1331_v8  ;;  %vm1353_vm6 = vweird.f32 %v2122_v12 }
 0x1ab   : > { %vm1354_vm8 = vmor %vm1352_vm7, %vm1353_vm6 }
 0x1ac   : > { %v1349_v17 = vsub.f32 1.0, %v1348_v16 }
 0x1ae   : > { %v1350_v21 = vmul.f32 %v2122_v12, %v1349_v17 }
 0x1b0   : > { %v1351_v23 = vadd.f32 %v2122_v12, %v1350_v21 }
 0x1b2   : > { %v1355_v1 = vsel %vm1354_vm8, %v2122_v12, %v1351_v23 }
 0x1b3   : > { %v1360_v27 = vsel %vm1357_vm9, %v1359_v26, %v1355_v1 }
 0x1b4   : > { %v1364_v9 = vmul.f32 %v1362_v25, %v1360_v27 }
 0x1b6   : > { %v1367_v31 = vadd.f32 %v1365_v29, %v1364_v9 }
 0x1b8   : > { %v1371_v33 = vrot.slane %v1367_v31, 4 }
 0x1ba   : > { %v1372_v2 = vsel %vm1275_vm0, %v1366_v6, %v1371_v33 }
 0x1bb   : > { %v1374_v34 = vmul.f32 %v1372_v2, %v1368_v32 }
 0x1bd   : > { %1375 = vst [vmem:[%s272_s25] sm:$0xff] %v1374_v34 }
 0x1be PF: > { %s17_s23 = sadd.s32 1, %s2129_s23  }
 0x1bf   : > { %p14_p4 = scmp.ge.s32.totalorder %s17_s23, 4  }
 0x1c1   :  { %16 = sbr.rel (!%p14_p4) target bundleno = 2 (0x2), region = 80 }

</bundles_post_ra>
